<compile_context>
chip_gen: v7x
topology: tpu7x:2x2x1
jax: 0.10.0
libtpu: 0.0.40
codegen_flags: <defaults>
</compile_context>

<pallas_src>
import functools

import jax
import jax.numpy as jnp
from jax import lax
from jax.experimental import pallas as pl
from jax.experimental.pallas import tpu as pltpu

LANE = 128        # lane-dense padded task axis (and table-feature padding)
TILE_B_MAX = 1024 # max batch rows per grid step (review: 512-1024 on v5e/v6e)
SUBLANE_B = 16    # bf16 packs 16 sublanes per vreg -> batch tile multiple of 16


def _round_up(x, m):
    return (x + m - 1) // m * m


def _cdiv(x, m):
    return (x + m - 1) // m


def _tpu_vmem_budget():
    """Per-generation VMEM limit (bytes) handed to the compiler.

    ~100 MiB on 128-MiB parts (v5e/v6e), ~40 MiB on 64-MiB parts (v7x).
    Falls back to the conservative v7x number if the query is unavailable.
    """
    phys = 64 * 1024 * 1024
    try:
        info = pltpu.get_tpu_info()
        phys = int(getattr(info, "vmem_capacity_bytes", phys))
    except Exception:
        pass
    if phys >= 128 * 1024 * 1024:
        return 100 * 1024 * 1024
    return 40 * 1024 * 1024


def _footprint_bytes(tile_b, tk, f_tab_p, hidden):
    """Pipelined VMEM footprint of one grid step (double-buffered where needed)."""
    return (2 * tile_b * tk * 4                 # x_img tile (f32, double-buffered)
            + 2 * tile_b * f_tab_p * 4          # x_tab tile (f32, double-buffered)
            + 2 * tk * hidden * 2               # W1_img block (bf16, double-buffered)
            + 2 * (f_tab_p * hidden * 2         # W1_tab (bf16)
                   + hidden * 4                 # b1 (f32)
                   + hidden * LANE * 2          # W2 (bf16, lane-padded)
                   + LANE * 4)                  # b2 (f32, lane-padded)
            + 2 * tile_b * LANE * 4             # output tile (f32, double-buffered)
            + tile_b * hidden * 4)              # h accumulator scratch (f32)


def _choose_tiles(batch, f_img, f_tab_p, hidden, budget):
    """Pick (tile_b, tk) that fit the generation's VMEM budget.

    Prefer the largest batch tile (per-step overhead dominates on v7x's fast
    HBM), then the largest K tile. tk is either the full f_img or a power-of-two
    multiple of 128 (ragged last K block handled by in-kernel masking).
    """
    usable = int(budget * 0.8)  # headroom for Pallas-internal scratch
    tile_b = max(SUBLANE_B, min(TILE_B_MAX, _round_up(batch, SUBLANE_B)))
    min_tk = min(f_img, LANE)
    while tile_b > SUBLANE_B and _footprint_bytes(tile_b, min_tk, f_tab_p, hidden) > usable:
        tile_b = max(SUBLANE_B, _round_up(tile_b // 2, SUBLANE_B))
    if _footprint_bytes(tile_b, f_img, f_tab_p, hidden) <= usable:
        tk = f_img                      # whole image-feature axis in one K step
    else:
        tk = LANE
        while tk * 2 <= f_img and _footprint_bytes(tile_b, tk * 2, f_tab_p, hidden) <= usable:
            tk *= 2
    return tile_b, tk


def _multitask_head_kernel(x_img_ref, x_tab_ref, w1i_ref, w1t_ref, b1_ref,
                           w2_ref, b2_ref, o_ref, h_acc,
                           *, n_binary, f_img, tk, mask_k):
    """Fused multi-task head, batch-tiled (axis 0) x image-feature-tiled (axis 1).

    h      = relu(x_img @ W1_img + x_tab @ W1_tab + b1)   (K-accumulated in f32)
    logits = h @ W2 + b2                                  (task axis padded to 128 lanes)
    out    = sigmoid(logits) for the first n_binary columns, logits otherwise.
    """
    k = pl.program_id(1)

    @pl.when(k == 0)
    def _():
        h_acc[...] = jnp.zeros_like(h_acc)

    # f32 tiles come straight from HBM; cast to bf16 in-register for the MXU.
    x_blk = x_img_ref[...]
    w_blk = w1i_ref[...]
    if mask_k:  # static: only when tk does not divide f_img (ragged last K block)
        valid = f_img - k * tk
        col = lax.broadcasted_iota(jnp.int32, x_blk.shape, 1)
        x_blk = jnp.where(col < valid, x_blk, 0.0)
        row = lax.broadcasted_iota(jnp.int32, w_blk.shape, 0)
        w_blk = jnp.where(row < valid, w_blk, 0.0)

    h_acc[...] += jnp.dot(x_blk.astype(jnp.bfloat16), w_blk,
                          preferred_element_type=jnp.float32)

    @pl.when(k == pl.num_programs(1) - 1)
    def _():
        # Table-feature contribution (lane-padded to 128, zeros contribute 0).
        h = h_acc[...] + jnp.dot(x_tab_ref[...].astype(jnp.bfloat16), w1t_ref[...],
                                 preferred_element_type=jnp.float32)
        h = jnp.maximum(h + b1_ref[...], 0.0)
        logits = jnp.dot(h.astype(jnp.bfloat16), w2_ref[...],
                         preferred_element_type=jnp.float32) + b2_ref[...]
        # sigmoid (EUP) for binary-classification tasks, identity for
        # regression / survival tasks; both free filler under the HBM roofline.
        sig = jax.nn.sigmoid(logits)
        tcol = lax.broadcasted_iota(jnp.int32, logits.shape, 1)
        o_ref[...] = jnp.where(tcol < n_binary, sig, logits)
    # TODO(synk): segmentation tasks (round(sigmoid(out))) are excluded by
    # ignore_seg_tasks=True in the original forward, so they are not computed.


def captum_wrapper_forward(x_image, x_table, params):
    """Mirrors CaptumWrapper.forward for the synthetic multi-task model.

    x_image : (B, C, H, W) float32  (NCHW, as in PyTorch)
    x_table : (B, T_feat)  float32
    returns : (B, n_table_tasks) float32  == torch.stack(target_tensor, dim=1)
    """
    B = x_image.shape[0]
    # Feature packing glue: flatten NCHW image (free metadata reshape, no copy).
    x_img = x_image.reshape(B, -1)
    f_img = x_img.shape[1]
    f_tab = x_table.shape[1]

    hidden = params["w1"].shape[1]
    n_tasks = params["w2"].shape[1]
    n_binary = int(params["n_binary"])

    # Lane-dense table operand: pad f_tab to a multiple of 128 once (tiny, static).
    f_tab_p = _round_up(f_tab, LANE)
    x_tab_p = x_table if f_tab_p == f_tab else jnp.pad(
        x_table, ((0, 0), (0, f_tab_p - f_tab)))

    # Split W1 by feature group (image-features-first packing order, matching
    # the reference concat); cast MXU weight operands to bf16 (f32 accumulate).
    w1 = params["w1"]
    w1i = w1[:f_img].astype(jnp.bfloat16)
    w1t = (jnp.zeros((f_tab_p, hidden), jnp.float32)
           .at[:f_tab].set(w1[f_img:])).astype(jnp.bfloat16)
    b1 = params["b1"].astype(jnp.float32).reshape(1, hidden)
    # Pad the task axis of W2 / b2 to 128 lanes (unmasked output stores).
    w2p = (jnp.zeros((hidden, LANE), jnp.float32)
           .at[:, :n_tasks].set(params["w2"])).astype(jnp.bfloat16)
    b2p = jnp.zeros((1, LANE), jnp.float32).at[:, :n_tasks].set(params["b2"])

    # Generation-aware tiling: derive tile sizes from the VMEM budget.
    budget = _tpu_vmem_budget()
    tile_b, tk = _choose_tiles(B, f_img, f_tab_p, hidden, budget)
    nb = _cdiv(B, tile_b)          # ragged last batch block (masked stores)
    nk = _cdiv(f_img, tk)          # ragged last K block (masked in kernel)
    mask_k = (f_img % tk) != 0

    kernel = functools.partial(_multitask_head_kernel, n_binary=n_binary,
                               f_img=f_img, tk=tk, mask_k=mask_k)

    rows = nb * tile_b
    flops = (2 * rows * f_img * hidden
             + 2 * rows * f_tab_p * hidden
             + 2 * rows * hidden * LANE)
    bytes_accessed = (rows * f_img * 4 + rows * f_tab_p * 4      # f32 activations
                      + nb * f_img * hidden * 2                  # W1_img per batch tile
                      + f_tab_p * hidden * 2 + hidden * 4
                      + hidden * LANE * 2 + LANE * 4
                      + rows * LANE * 4)                         # f32 output

    out = pl.pallas_call(
        kernel,
        out_shape=jax.ShapeDtypeStruct((B, LANE), jnp.float32),
        grid_spec=pltpu.PrefetchScalarGridSpec(
            num_scalar_prefetch=0,
            grid=(nb, nk),                                   # K (reduction) axis last
            in_specs=[
                pl.BlockSpec((tile_b, tk), lambda i, k: (i, k)),        # x_img tile (f32)
                pl.BlockSpec((tile_b, f_tab_p), lambda i, k: (i, 0)),   # x_tab tile (f32)
                pl.BlockSpec((tk, hidden), lambda i, k: (k, 0)),        # W1_img block (bf16)
                pl.BlockSpec((f_tab_p, hidden), lambda i, k: (0, 0)),   # W1_tab (bf16)
                pl.BlockSpec((1, hidden), lambda i, k: (0, 0)),         # b1
                pl.BlockSpec((hidden, LANE), lambda i, k: (0, 0)),      # W2 (lane-padded)
                pl.BlockSpec((1, LANE), lambda i, k: (0, 0)),           # b2 (lane-padded)
            ],
            out_specs=pl.BlockSpec((tile_b, LANE), lambda i, k: (i, 0)),
            scratch_shapes=[pltpu.VMEM((tile_b, hidden), jnp.float32)], # h accumulator
        ),
        compiler_params=pltpu.CompilerParams(
            dimension_semantics=("parallel", "arbitrary"),
            vmem_limit_bytes=budget,
        ),
        cost_estimate=pl.CostEstimate(
            flops=flops,
            transcendentals=rows * LANE,
            bytes_accessed=bytes_accessed,
        ),
    )(x_img, x_tab_p, w1i, w1t, b1, w2p, b2p)

    # Slice away the lane padding of the task axis (ragged batch rows were
    # never stored thanks to masked output writes; out already has B rows).
    return out[:, :n_tasks]


def make_params(key, in_features, hidden, n_tasks, n_binary):
    """Deterministic synthetic model parameters (no checkpoint loading)."""
    k1, k2, k3, k4 = jax.random.split(key, 4)
    w1 = jax.random.normal(k1, (in_features, hidden), jnp.float32) * 0.02
    b1 = jax.random.normal(k2, (1, hidden), jnp.float32) * 0.01
    w2 = jax.random.normal(k3, (hidden, n_tasks), jnp.float32) * 0.1
    b2 = jax.random.normal(k4, (1, n_tasks), jnp.float32) * 0.01
    # Task layout: first n_binary tasks are binary classification (sigmoid),
    # the rest are regression / survival-analysis (identity).
    return {"w1": w1, "b1": b1, "w2": w2, "b2": b2, "n_binary": n_binary}


def reference_forward(x_image, x_table, params):
    """Pure-JAX f32 reference for correctness checking."""
    B = x_image.shape[0]
    x = jnp.concatenate([x_image.reshape(B, -1), x_table], axis=-1).astype(jnp.float32)
    h = jnp.maximum(x @ params["w1"] + params["b1"], 0.0)
    logits = h @ params["w2"] + params["b2"]
    sig = jax.nn.sigmoid(logits)
    n_tasks = params["w2"].shape[1]
    is_binary = (jnp.arange(n_tasks) < params["n_binary"]).reshape(1, n_tasks)
    return jnp.where(is_binary, sig, logits)


if __name__ == "__main__":
    # Small shapes consistent with the wrapper: one image modality + table
    # features, 2 binary-classification tasks + 1 regression + 1 survival task.
    B, C, H, W = 2, 4, 16, 16
    T_FEAT = 8
    HIDDEN = 32
    N_BINARY, N_REG, N_SURV = 2, 1, 1
    N_TASKS = N_BINARY + N_REG + N_SURV
    IN_FEATURES = C * H * W + T_FEAT

    key = jax.random.PRNGKey(0)
    k_img, k_tab, k_par = jax.random.split(key, 3)
    x_image = jax.random.normal(k_img, (B, C, H, W), jnp.float32)   # NCHW
    x_table = jax.random.normal(k_tab, (B, T_FEAT), jnp.float32)
    params = make_params(k_par, IN_FEATURES, HIDDEN, N_TASKS, N_BINARY)

    out = captum_wrapper_forward(x_image, x_table, params)
    out = jax.block_until_ready(out)

    ref = reference_forward(x_image, x_table, params)
    assert out.shape == (B, N_TASKS), out.shape
    # bf16 MXU inputs (f32 accumulation) -> looser tolerance than pure f32.
    # NOTE: re-validate tolerance at production f_img (~1.5e5); bf16 input
    # quantization error grows with the reduction length.
    assert jnp.allclose(out, ref, atol=2e-2, rtol=2e-2), (out, ref)

    print("KERNEL_OK")
</pallas_src>

<mosaic_0001>
module attributes {stable_mosaic.version = 11 : i64} {
  func.func @_multitask_head_kernel(%arg0: i32, %arg1: i32, %arg2: memref<16x1024xf32, #tpu.memory_space<vmem>>, %arg3: memref<16x128xf32, #tpu.memory_space<vmem>>, %arg4: memref<1024x32xbf16, #tpu.memory_space<vmem>>, %arg5: memref<128x32xbf16, #tpu.memory_space<vmem>>, %arg6: memref<1x32xf32, #tpu.memory_space<vmem>>, %arg7: memref<32x128xbf16, #tpu.memory_space<vmem>>, %arg8: memref<1x128xf32, #tpu.memory_space<vmem>>, %arg9: memref<16x128xf32, #tpu.memory_space<vmem>>, %arg10: memref<16x32xf32, #tpu.memory_space<vmem>>) attributes {dimension_semantics = [#tpu.dimension_semantics<parallel>, #tpu.dimension_semantics<arbitrary>], iteration_bounds = array<i64: 1, 1>, scalar_prefetch = 0 : i64, scratch_operands = 1 : i64, tpu.core_type = #tpu.core_type<tc>, window_params = [{transform_indices = @transform_0, window_bounds = array<i64: 16, 1024>}, {transform_indices = @transform_1, window_bounds = array<i64: 16, 128>}, {transform_indices = @transform_2, window_bounds = array<i64: 1024, 32>}, {pipeline_mode = #tpu.pipeline_mode<synchronous>, transform_indices = @transform_3, window_bounds = array<i64: 128, 32>}, {pipeline_mode = #tpu.pipeline_mode<synchronous>, transform_indices = @transform_4, window_bounds = array<i64: 1, 32>}, {pipeline_mode = #tpu.pipeline_mode<synchronous>, transform_indices = @transform_5, window_bounds = array<i64: 32, 128>}, {pipeline_mode = #tpu.pipeline_mode<synchronous>, transform_indices = @transform_6, window_bounds = array<i64: 1, 128>}, {transform_indices = @transform_7, window_bounds = array<i64: 16, 128>}]} {
    %c0_i32 = arith.constant 0 : i32
    %0 = arith.cmpi eq, %arg1, %c0_i32 : i32
    %1 = arith.extui %0 : i1 to i32
    %c0_i32_0 = arith.constant 0 : i32
    %2 = arith.cmpi ne, %1, %c0_i32_0 : i32
    scf.if %2 {
      %cst_10 = arith.constant 0.000000e+00 : f32
      %13 = vector.broadcast %cst_10 : f32 to vector<16x32xf32>
      %c0_11 = arith.constant 0 : index
      %c0_12 = arith.constant 0 : index
      %14 = vector.load %arg10[%c0_11, %c0_12] : memref<16x32xf32, #tpu.memory_space<vmem>>, vector<16x32xf32>
      tpu.vector_store %arg10[%c0_11, %c0_12], %13 {strides = array<i32>} : memref<16x32xf32, #tpu.memory_space<vmem>>, vector<16x32xf32>,
    } else {
    }
    %c0 = arith.constant 0 : index
    %c0_1 = arith.constant 0 : index
    %3 = vector.load %arg2[%c0, %c0_1] : memref<16x1024xf32, #tpu.memory_space<vmem>>, vector<16x1024xf32>
    %c0_2 = arith.constant 0 : index
    %c0_3 = arith.constant 0 : index
    %4 = vector.load %arg4[%c0_2, %c0_3] : memref<1024x32xbf16, #tpu.memory_space<vmem>>, vector<1024x32xbf16>
    %c0_4 = arith.constant 0 : index
    %c0_5 = arith.constant 0 : index
    %5 = vector.load %arg10[%c0_4, %c0_5] : memref<16x32xf32, #tpu.memory_space<vmem>>, vector<16x32xf32>
    %6 = arith.truncf %3 : vector<16x1024xf32> to vector<16x1024xbf16>
    %cst = arith.constant dense<0.000000e+00> : vector<16x32xf32>
    %7 = tpu.matmul %6, %4, %cst {dimension_numbers = #tpu.dot_dimension_numbers<[1], [0], [0], [1], [0, 0, 1, 1], [], []>} : vector<16x1024xbf16>, vector<1024x32xbf16>, vector<16x32xf32> -> vector<16x32xf32>
    %8 = arith.addf %5, %7 : vector<16x32xf32>
    %c0_6 = arith.constant 0 : index
    %c0_7 = arith.constant 0 : index
    %9 = vector.load %arg10[%c0_6, %c0_7] : memref<16x32xf32, #tpu.memory_space<vmem>>, vector<16x32xf32>
    tpu.vector_store %arg10[%c0_6, %c0_7], %8 {strides = array<i32>} : memref<16x32xf32, #tpu.memory_space<vmem>>, vector<16x32xf32>,
    %c0_i32_8 = arith.constant 0 : i32
    %10 = arith.cmpi eq, %arg1, %c0_i32_8 : i32
    %11 = arith.extui %10 : i1 to i32
    %c0_i32_9 = arith.constant 0 : i32
    %12 = arith.cmpi ne, %11, %c0_i32_9 : i32
    scf.if %12 {
      %c0_10 = arith.constant 0 : index
      %c0_11 = arith.constant 0 : index
      %13 = vector.load %arg10[%c0_10, %c0_11] : memref<16x32xf32, #tpu.memory_space<vmem>>, vector<16x32xf32>
      %c0_12 = arith.constant 0 : index
      %c0_13 = arith.constant 0 : index
      %14 = vector.load %arg3[%c0_12, %c0_13] : memref<16x128xf32, #tpu.memory_space<vmem>>, vector<16x128xf32>
      %15 = arith.truncf %14 : vector<16x128xf32> to vector<16x128xbf16>
      %c0_14 = arith.constant 0 : index
      %c0_15 = arith.constant 0 : index
      %16 = vector.load %arg5[%c0_14, %c0_15] : memref<128x32xbf16, #tpu.memory_space<vmem>>, vector<128x32xbf16>
      %cst_16 = arith.constant dense<0.000000e+00> : vector<16x32xf32>
      %17 = tpu.matmul %15, %16, %cst_16 {dimension_numbers = #tpu.dot_dimension_numbers<[1], [0], [0], [1], [0, 0, 1, 1], [], []>} : vector<16x128xbf16>, vector<128x32xbf16>, vector<16x32xf32> -> vector<16x32xf32>
      %18 = arith.addf %13, %17 : vector<16x32xf32>
      %c0_17 = arith.constant 0 : index
      %c0_18 = arith.constant 0 : index
      %19 = vector.load %arg6[%c0_17, %c0_18] : memref<1x32xf32, #tpu.memory_space<vmem>>, vector<1x32xf32>
      %20 = vector.broadcast %19 : vector<1x32xf32> to vector<16x32xf32>
      %21 = arith.addf %18, %20 : vector<16x32xf32>
      %cst_19 = arith.constant 0.000000e+00 : f32
      %22 = vector.broadcast %cst_19 : f32 to vector<16x32xf32>
      %23 = arith.maximumf %21, %22 : vector<16x32xf32>
      %24 = arith.truncf %23 : vector<16x32xf32> to vector<16x32xbf16>
      %c0_20 = arith.constant 0 : index
      %c0_21 = arith.constant 0 : index
      %25 = vector.load %arg7[%c0_20, %c0_21] : memref<32x128xbf16, #tpu.memory_space<vmem>>, vector<32x128xbf16>
      %cst_22 = arith.constant dense<0.000000e+00> : vector<16x128xf32>
      %26 = tpu.matmul %24, %25, %cst_22 {dimension_numbers = #tpu.dot_dimension_numbers<[1], [0], [0], [1], [0, 0, 1, 1], [], []>} : vector<16x32xbf16>, vector<32x128xbf16>, vector<16x128xf32> -> vector<16x128xf32>
      %c0_23 = arith.constant 0 : index
      %c0_24 = arith.constant 0 : index
      %27 = vector.load %arg8[%c0_23, %c0_24] : memref<1x128xf32, #tpu.memory_space<vmem>>, vector<1x128xf32>
      %28 = vector.broadcast %27 : vector<1x128xf32> to vector<16x128xf32>
      %29 = arith.addf %26, %28 : vector<16x128xf32>
      %30 = arith.negf %29 : vector<16x128xf32>
      %31 = math.exp %30 : vector<16x128xf32>
      %cst_25 = arith.constant 1.000000e+00 : f32
      %32 = vector.broadcast %cst_25 : f32 to vector<16x128xf32>
      %33 = arith.addf %32, %31 : vector<16x128xf32>
      %34 = arith.divf %32, %33 : vector<16x128xf32>
      %35 = tpu.iota {dimensions = array<i32: 1>} : vector<16x128xi32>
      %c2_i32 = arith.constant 2 : i32
      %36 = vector.broadcast %c2_i32 : i32 to vector<16x128xi32>
      %37 = arith.cmpi slt, %35, %36 : vector<16x128xi32>
      %38 = arith.select %37, %34, %29 : vector<16x128xi1>, vector<16x128xf32>
      %c0_26 = arith.constant 0 : index
      %c0_27 = arith.constant 0 : index
      %39 = vector.load %arg9[%c0_26, %c0_27] : memref<16x128xf32, #tpu.memory_space<vmem>>, vector<16x128xf32>
      tpu.vector_store %arg9[%c0_26, %c0_27], %38 {strides = array<i32>} : memref<16x128xf32, #tpu.memory_space<vmem>>, vector<16x128xf32>,
    } else {
    }
    return
  }
  func.func @transform_0(%arg0: i32, %arg1: i32) -> (i32, i32) {
    %c0_i32 = arith.constant 0 : i32
    return %arg0, %arg1 : i32, i32
  }
  func.func @transform_1(%arg0: i32, %arg1: i32) -> (i32, i32) {
    %c0_i32 = arith.constant 0 : i32
    %c0_i32_0 = arith.constant 0 : i32
    return %arg0, %c0_i32 : i32, i32
  }
  func.func @transform_2(%arg0: i32, %arg1: i32) -> (i32, i32) {
    %c0_i32 = arith.constant 0 : i32
    %c0_i32_0 = arith.constant 0 : i32
    return %arg1, %c0_i32 : i32, i32
  }
  func.func @transform_3(%arg0: i32, %arg1: i32) -> (i32, i32) {
    %c0_i32 = arith.constant 0 : i32
    %c0_i32_0 = arith.constant 0 : i32
    %c0_i32_1 = arith.constant 0 : i32
    return %c0_i32, %c0_i32_0 : i32, i32
  }
  func.func @transform_4(%arg0: i32, %arg1: i32) -> (i32, i32) {
    %c0_i32 = arith.constant 0 : i32
    %c0_i32_0 = arith.constant 0 : i32
    %c0_i32_1 = arith.constant 0 : i32
    return %c0_i32, %c0_i32_0 : i32, i32
  }
  func.func @transform_5(%arg0: i32, %arg1: i32) -> (i32, i32) {
    %c0_i32 = arith.constant 0 : i32
    %c0_i32_0 = arith.constant 0 : i32
    %c0_i32_1 = arith.constant 0 : i32
    return %c0_i32, %c0_i32_0 : i32, i32
  }
  func.func @transform_6(%arg0: i32, %arg1: i32) -> (i32, i32) {
    %c0_i32 = arith.constant 0 : i32
    %c0_i32_0 = arith.constant 0 : i32
    %c0_i32_1 = arith.constant 0 : i32
    return %c0_i32, %c0_i32_0 : i32, i32
  }
  func.func @transform_7(%arg0: i32, %arg1: i32) -> (i32, i32) {
    %c0_i32 = arith.constant 0 : i32
    %c0_i32_0 = arith.constant 0 : i32
    return %arg0, %c0_i32 : i32, i32
  }
}

</mosaic_0001>

<bundles_post_ra>
// kernel: tpu_custom_call.1
= control target key start
LH: loop header
LB: loop body
LE: loop exit
PB: predicated region body
PF: predicated region fallthrough
CT: control target
= control target key end

     0   :  { %12 = vsyncpa [#allocation4], 0  ;;  %v204_v29 = vlaneseq  ;;  %v1490_v33 = vmov 1983009808   ;;  %vm1492_vm0 = vmmov 0   ;;  %vm32_vm1 = vcmask 261120   ;;  %s1855_s0 = inlined_call_operand.vmem [shape: f32[2,1024], index: 0, kind: input, shape index: {}]   ;;  %s1856_s1 = inlined_call_operand.vmem [shape: f32[2,128], index: 1, kind: input, shape index: {}]   ;;  %s1857_s2 = inlined_call_operand.vmem [shape: bf16[1024,32], index: 2, kind: input, shape index: {}]   ;;  %s1858_s3 = inlined_call_operand.vmem [shape: bf16[128,32], index: 3, kind: input, shape index: {}]   ;;  %s1859_s4 = inlined_call_operand.vmem [shape: f32[1,32], index: 4, kind: input, shape index: {}]   ;;  %s1860_s5 = inlined_call_operand.vmem [shape: bf16[32,128], index: 5, kind: input, shape index: {}]   ;;  %s1861_s6 = inlined_call_operand.vmem [shape: f32[1,128], index: 6, kind: input, shape index: {}]   ;;  %s1862_s7 = inlined_call_operand.hbm [shape: f32[2,128], index: 7, kind: output, shape index: {}]  }
   0x1   :  { %v1360_v0 = vld [vmem:[%s1857_s2 + $0x40] sm:$0xff]   ;;  %v1364_v4 = vld [vmem:[%s1857_s2 + $0x48] sm:$0xff]   ;;  %v1368_v8 = vld [vmem:[%s1857_s2 + $0x50] sm:$0xff]   ;;  %v202_v34 = vunpack.c.l.s4 %v1490_v33 }
   0x2   :  { %v1361_v1 = vld [vmem:[%s1857_s2 + $0xc0] sm:$0xff]   ;;  %1226 = vmatprep.subr.bf16.mxu0 %v1360_v0  ;;  %v1365_v5 = vld [vmem:[%s1857_s2 + $0xc8] sm:$0xff]   ;;  %v1369_v9 = vld [vmem:[%s1857_s2 + $0xd0] sm:$0xff]   ;;  %v205_v35 = vshrl.u32 %v204_v29, 7 }
   0x3   :  { %v1362_v2 = vld [vmem:[%s1857_s2] sm:$0xff]   ;;  %1248 = vmatprep.subr.bf16.mxu1 %v1361_v1  ;;  %v1366_v6 = vld [vmem:[%s1857_s2 + $0x8] sm:$0xff]   ;;  %v1370_v10 = vld [vmem:[%s1857_s2 + $0x10] sm:$0xff]   ;;  %v203_v38 = vunpack.c.0.s8 %v202_v34 }
   0x4   :  { %v1363_v3 = vld [vmem:[%s1857_s2 + $0x80] sm:$0xff]   ;;  %1227 = vmatpush3.bf16.msra.mxu0 %v1362_v2  ;;  %v1367_v7 = vld [vmem:[%s1857_s2 + $0x88] sm:$0xff]   ;;  %v1371_v11 = vld [vmem:[%s1857_s2 + $0x90] sm:$0xff]  }
   0x5   :  { %1249 = vmatpush3.bf16.msra.mxu1 %v1363_v3  ;;  %1228 = vmatprep.subr.bf16.mxu0 %v1364_v4  ;;  %v1372_v12 = vld [vmem:[%s1857_s2 + $0x58] sm:$0xff]   ;;  %v1376_v16 = vld [vmem:[%s1857_s2 + $0x60] sm:$0xff]   ;;  %v1380_v20 = vld [vmem:[%s1857_s2 + $0x68] sm:$0xff]   ;;  %v1651_v43 = vsub.s32 %v203_v38, %v205_v35 }
   0x6   :  { %1250 = vmatprep.subr.bf16.mxu1 %v1365_v5  ;;  %v1373_v13 = vld [vmem:[%s1857_s2 + $0xd8] sm:$0xff]   ;;  %v1377_v17 = vld [vmem:[%s1857_s2 + $0xe0] sm:$0xff]   ;;  %v1381_v21 = vld [vmem:[%s1857_s2 + $0xe8] sm:$0xff]  }
   0x7   :  { %v1374_v14 = vld [vmem:[%s1857_s2 + $0x18] sm:$0xff]   ;;  %v1378_v18 = vld [vmem:[%s1857_s2 + $0x20] sm:$0xff]   ;;  %v1382_v22 = vld [vmem:[%s1857_s2 + $0x28] sm:$0xff]  }
   0x8   :  { %1229 = vmatpush3.bf16.msra.mxu0 %v1366_v6  ;;  %v1375_v15 = vld [vmem:[%s1857_s2 + $0x98] sm:$0xff]   ;;  %v1379_v19 = vld [vmem:[%s1857_s2 + $0xa0] sm:$0xff]   ;;  %v1383_v23 = vld [vmem:[%s1857_s2 + $0xa8] sm:$0xff]  }
   0x9   :  { %1251 = vmatpush3.bf16.msra.mxu1 %v1367_v7  ;;  %1230 = vmatprep.subr.bf16.mxu0 %v1368_v8  ;;  %v1384_v24 = vld [vmem:[%s1857_s2 + $0x70] sm:$0xff]   ;;  %v1388_v28 = vld [vmem:[%s1857_s2 + $0x78] sm:$0xff]   ;;  %v1404_v46 = vld [vmem:[%s1857_s2 + $0x140] sm:$0xff]  }
   0xa   :  { %1252 = vmatprep.subr.bf16.mxu1 %v1369_v9  ;;  %v1385_v25 = vld [vmem:[%s1857_s2 + $0xf0] sm:$0xff]   ;;  %v1389_v30 = vld [vmem:[%s1857_s2 + $0xf8] sm:$0xff]   ;;  %v1406_v55 = vld [vmem:[%s1857_s2 + $0x1c0] sm:$0xff]  }
   0xb   :  { %v1386_v26 = vld [vmem:[%s1857_s2 + $0x30] sm:$0xff]   ;;  %v1390_v31 = vld [vmem:[%s1857_s2 + $0x38] sm:$0xff]   ;;  %v1405_v0 = vld [vmem:[%s1857_s2 + $0x100] sm:$0xff]  }
   0xc   :  { %1231 = vmatpush3.bf16.msra.mxu0 %v1370_v10  ;;  %v1387_v27 = vld [vmem:[%s1857_s2 + $0xb0] sm:$0xff]   ;;  %v1391_v32 = vld [vmem:[%s1857_s2 + $0xb8] sm:$0xff]   ;;  %v1407_v3 = vld [vmem:[%s1857_s2 + $0x180] sm:$0xff]  }
   0xd   :  { %1253 = vmatpush3.bf16.msra.mxu1 %v1371_v11  ;;  %1232 = vmatprep.subr.bf16.mxu0 %v1372_v12  ;;  %v1392_v36 = vld [vmem:[%s1855_s0] ss:$16 sps:$4 sm:$0xff]   ;;  %v1400_v41 = vld [vmem:[%s1855_s0 + $0x4] ss:$16 sps:$4 sm:$0xff]   ;;  %v1408_v6 = vld [vmem:[%s1857_s2 + $0x148] sm:$0xff]  }
   0xe   :  { %1254 = vmatprep.subr.bf16.mxu1 %v1373_v13  ;;  %v1394_v37 = vld [vmem:[%s1855_s0 + $0x20] ss:$16 sps:$4 sm:$0xff]   ;;  %v1401_v42 = vld [vmem:[%s1855_s0 + $0x24] ss:$16 sps:$4 sm:$0xff]   ;;  %v207_v47 = vrot.slane %v1392_v36, %v1651_v43  ;;  %v214_v51 = vrot.slane %v1400_v41, %v1651_v43  ;;  %v1410_v7 = vld [vmem:[%s1857_s2 + $0x1c8] sm:$0xff]  }
   0xf   :  { %v1396_v39 = vld [vmem:[%s1855_s0 + $0x40] ss:$16 sps:$4 sm:$0xff]   ;;  %v1402_v44 = vld [vmem:[%s1855_s0 + $0x44] ss:$16 sps:$4 sm:$0xff]   ;;  %v221_v48 = vrot.slane %v1394_v37, %v1651_v43  ;;  %v228_v52 = vrot.slane %v1401_v42, %v1651_v43  ;;  %v1409_v8 = vld [vmem:[%s1857_s2 + $0x108] sm:$0xff]  }
  0x10   :  { %1233 = vmatpush3.bf16.msra.mxu0 %v1374_v14  ;;  %v1398_v40 = vld [vmem:[%s1855_s0 + $0x60] ss:$16 sps:$4 sm:$0xff]   ;;  %v1403_v45 = vld [vmem:[%s1855_s0 + $0x64] ss:$16 sps:$4 sm:$0xff]   ;;  %v279_v49 = vrot.slane %v1396_v39, %v1651_v43  ;;  %v286_v53 = vrot.slane %v1402_v44, %v1651_v43  ;;  %v1411_v9 = vld [vmem:[%s1857_s2 + $0x188] sm:$0xff]  }
  0x11   :  { %1255 = vmatpush3.bf16.msra.mxu1 %v1375_v15  ;;  %1234 = vmatprep.subr.bf16.mxu0 %v1376_v16  ;;  %v293_v50 = vrot.slane %v1398_v40, %v1651_v43  ;;  %v300_v54 = vrot.slane %v1403_v45, %v1651_v43  ;;  %v230_v56 = vcombine.high %v207_v47, %v221_v48  ;;  %v1412_v10 = vld [vmem:[%s1857_s2 + $0x150] sm:$0xff]   ;;  %v1416_v14 = vld [vmem:[%s1857_s2 + $0x158] sm:$0xff]  }
  0x12   :  { %1256 = vmatprep.subr.bf16.mxu1 %v1377_v17  ;;  %v229_v58 = vcombine.low %v207_v47, %v221_v48  ;;  %v232_v60 = vcombine.high %v214_v51, %v228_v52  ;;  %v231_v62 = vcombine.low %v214_v51, %v228_v52  ;;  %v1414_v11 = vld [vmem:[%s1857_s2 + $0x1d0] sm:$0xff]   ;;  %v1418_v15 = vld [vmem:[%s1857_s2 + $0x1d8] sm:$0xff]  }
  0x13   :  { %v302_v57 = vcombine.high %v279_v49, %v293_v50  ;;  %v301_v59 = vcombine.low %v279_v49, %v293_v50  ;;  %v304_v61 = vcombine.high %v286_v53, %v300_v54  ;;  %v303_v63 = vcombine.low %v286_v53, %v300_v54  ;;  %v1413_v12 = vld [vmem:[%s1857_s2 + $0x110] sm:$0xff]   ;;  %v1417_v16 = vld [vmem:[%s1857_s2 + $0x118] sm:$0xff]  }
  0x14   :  { %1235 = vmatpush3.bf16.msra.mxu0 %v1378_v18  ;;  %v1415_v13 = vld [vmem:[%s1857_s2 + $0x190] sm:$0xff]   ;;  %v1419_v17 = vld [vmem:[%s1857_s2 + $0x198] sm:$0xff]   ;;  %v1420_v18 = vld [vmem:[%s1857_s2 + $0x160] sm:$0xff]   ;;  %v1491_v53 = vmov 0.0  }
  0x15   :  { %1257 = vmatpush3.bf16.msra.mxu1 %v1379_v19  ;;  %1236 = vmatprep.subr.bf16.mxu0 %v1380_v20  ;;  %v358_v1 = vpack.c.bf16 %v302_v57, %v230_v56  ;;  %v357_v2 = vpack.c.bf16 %v301_v59, %v229_v58  ;;  %v360_v4 = vpack.c.bf16 %v304_v61, %v232_v60  ;;  %v1422_v19 = vld [vmem:[%s1857_s2 + $0x1e0] sm:$0xff]   ;;  %v1433_v33 = vld [vmem:[%s1857_s2 + $0x138] sm:$0xff]  }
  0x16   :  { %1258 = vmatprep.subr.bf16.mxu1 %v1381_v21  ;;  %v359_v5 = vpack.c.bf16 %v303_v63, %v231_v62  ;;  %v1421_v20 = vld [vmem:[%s1857_s2 + $0x120] sm:$0xff]   ;;  %v1435_v34 = vld [vmem:[%s1855_s0 + $0x8] ss:$16 sps:$4 sm:$0xff]   ;;  %v1444_v41 = vld [vmem:[%s1855_s0 + $0xc] ss:$16 sps:$4 sm:$0xff]   ;;  %33 = vst.msk [vmem:[#allocation2] sm:$0xff] %vm32_vm1, %v1491_v53 }
  0x17   :  { %781 = vmatprep.mubr.bf16.mxu0 %v358_v1  ;;  %822 = vmatprep.mubr.bf16.mxu1 %v360_v4  ;;  %v1423_v21 = vld [vmem:[%s1857_s2 + $0x1a0] sm:$0xff]   ;;  %v1437_v35 = vld [vmem:[%s1855_s0 + $0x28] ss:$16 sps:$4 sm:$0xff]   ;;  %v243_v38 = vrot.slane %v1435_v34, %v1651_v43  ;;  %v1445_v45 = vld [vmem:[%s1855_s0 + $0x2c] ss:$16 sps:$4 sm:$0xff]   ;;  %v250_v50 = vrot.slane %v1444_v41, %v1651_v43  ;;  %34 = vst.msk [vmem:[#allocation2 + $0x8] sm:$0xff] %vm32_vm1, %v1491_v53 }
  0x18   :  { %1237 = vmatpush3.bf16.msra.mxu0 %v1382_v22  ;;  %v1424_v22 = vld [vmem:[%s1857_s2 + $0x168] sm:$0xff]   ;;  %v257_v39 = vrot.slane %v1437_v35, %v1651_v43  ;;  %v1443_v40 = vld [vmem:[%s1857_s2 + $0x1b8] sm:$0xff]   ;;  %v264_v54 = vrot.slane %v1445_v45, %v1651_v43  ;;  %v1448_v60 = vld [vmem:[%s1858_s3] sm:$0xff]  }
  0x19   :  { %1259 = vmatpush3.bf16.msra.mxu1 %v1383_v23  ;;  %1238 = vmatprep.subr.bf16.mxu0 %v1384_v24  ;;  %v1426_v23 = vld [vmem:[%s1857_s2 + $0x1e8] sm:$0xff]   ;;  %v1452_v4 = vld [vmem:[%s1858_s3 + $0x20] sm:$0xff]  }
  0x1a   :  { %1260 = vmatprep.subr.bf16.mxu1 %v1385_v25  ;;  %v1425_v24 = vld [vmem:[%s1857_s2 + $0x128] sm:$0xff]   ;;  %v266_v48 = vcombine.high %v243_v38, %v257_v39  ;;  %v265_v49 = vcombine.low %v243_v38, %v257_v39  ;;  %v268_v59 = vcombine.high %v250_v50, %v264_v54  ;;  %v267_v61 = vcombine.low %v250_v50, %v264_v54 }
  0x1b   :  { %v1427_v25 = vld [vmem:[%s1857_s2 + $0x1a8] sm:$0xff]  }
  0x1c   :  { %1239 = vmatpush3.bf16.msra.mxu0 %v1386_v26  ;;  %v1428_v26 = vld [vmem:[%s1857_s2 + $0x170] sm:$0xff]   ;;  %v1439_v36 = vld [vmem:[%s1855_s0 + $0x48] ss:$16 sps:$4 sm:$0xff]   ;;  %v1447_v47 = vld [vmem:[%s1855_s0 + $0x6c] ss:$16 sps:$4 sm:$0xff]  }
  0x1d   :  { %1261 = vmatpush3.bf16.msra.mxu1 %v1387_v27  ;;  %1240 = vmatprep.subr.bf16.mxu0 %v1388_v28  ;;  %v1429_v27 = vld [vmem:[%s1857_s2 + $0x130] sm:$0xff]   ;;  %v1441_v37 = vld [vmem:[%s1855_s0 + $0x68] ss:$16 sps:$4 sm:$0xff]   ;;  %v315_v42 = vrot.slane %v1439_v36, %v1651_v43  ;;  %v336_v56 = vrot.slane %v1447_v47, %v1651_v43 }
  0x1e   :  { %1262 = vmatprep.subr.bf16.mxu1 %v1389_v30  ;;  %v1430_v28 = vld [vmem:[%s1857_s2 + $0x1f0] sm:$0xff]   ;;  %v329_v44 = vrot.slane %v1441_v37, %v1651_v43  ;;  %v180_v45 = vld [vmem:[#allocation2 + $0x8] sm:$0xff] }
  0x1f   :  { %v1431_v30 = vld [vmem:[%s1857_s2 + $0x1b0] sm:$0xff]  }
  0x20   :  { %1241 = vmatpush3.bf16.msra.mxu0 %v1390_v31  ;;  %v1432_v31 = vld [vmem:[%s1857_s2 + $0x178] sm:$0xff]   ;;  %v338_v51 = vcombine.high %v315_v42, %v329_v44  ;;  %v337_v52 = vcombine.low %v315_v42, %v329_v44 }
  0x21   :  { %1263 = vmatpush3.bf16.msra.mxu1 %v1391_v32  ;;  %1270 = vmatprep.subr.bf16.mxu0 %v1404_v46  ;;  %v1434_v32 = vld [vmem:[%s1857_s2 + $0x1f8] sm:$0xff]  }
  0x22   :  { %1292 = vmatprep.subr.bf16.mxu1 %v1406_v55  ;;  %v1446_v46 = vld [vmem:[%s1855_s0 + $0x4c] ss:$16 sps:$4 sm:$0xff]   ;;  %v362_v57 = vpack.c.bf16 %v338_v51, %v266_v48  ;;  %v361_v58 = vpack.c.bf16 %v337_v52, %v265_v49  ;;  %v1219_v51 = vld [vmem:[%s1859_s4] ss:$0 sm:$0xff] }
  0x23   :  { %782 = vmatmul.mubr.bf16.vlgmr.msra.gmra.mrb[0].mxu0 %v357_v2  ;;  %v322_v55 = vrot.slane %v1446_v46, %v1651_v43  ;;  %v1449_v43 = vld [vmem:[%s1858_s3 + $0x8] sm:$0xff]   ;;  %v1450_v2 = vld [vmem:[%s1858_s3 + $0x10] sm:$0xff]  }
  0x24   :  { %823 = vmatmul.mubr.bf16.vlgmr.msra.gmra.mrb[0].mxu1 %v359_v5  ;;  %1271 = vmatpush3.bf16.msra.mxu0 %v1405_v0  ;;  %v1453_v5 = vld [vmem:[%s1858_s3 + $0x28] sm:$0xff]  }
  0x25   :  { %1293 = vmatpush3.bf16.msra.mxu1 %v1407_v3  ;;  %1272 = vmatprep.subr.bf16.mxu0 %v1408_v6  ;;  %v340_v62 = vcombine.high %v322_v55, %v336_v56  ;;  %v339_v63 = vcombine.low %v322_v55, %v336_v56  ;;  %v1451_v3 = vld [vmem:[%s1858_s3 + $0x18] sm:$0xff]   ;;  %v1454_v6 = vld [vmem:[%s1858_s3 + $0x30] sm:$0xff]  }
  0x26   :  { %1294 = vmatprep.subr.bf16.mxu1 %v1410_v7  ;;  %863 = vmatprep.mubr.bf16.mxu0 %v362_v57  ;;  %v1455_v7 = vld [vmem:[%s1858_s3 + $0x38] sm:$0xff]  }
  0x27   :  { %v364_v0 = vpack.c.bf16 %v340_v62, %v268_v59  ;;  %v363_v1 = vpack.c.bf16 %v339_v63, %v267_v61  ;;  %v1220_v63 = vld [vmem:[%s1861_s6] ss:$0 sm:$0xff] }
  0x28   :  { %1273 = vmatpush3.bf16.msra.mxu0 %v1409_v8  ;;  %v923_v8 = vld [vmem:[%s1856_s1] sm:$0xff] }
  0x29   :  { %1295 = vmatpush3.bf16.msra.mxu1 %v1411_v9  ;;  %1274 = vmatprep.subr.bf16.mxu0 %v1412_v10  ;;  %v924_v9 = vld [vmem:[%s1856_s1 + $0x8] sm:$0xff] }
  0x2a   :  { %1296 = vmatprep.subr.bf16.mxu1 %v1414_v11  ;;  %904 = vmatprep.mubr.bf16.mxu1 %v364_v0  ;;  %v925_v10 = vpack.c.bf16 %v924_v9, %v923_v8  ;;  %v1456_v11 = vld [vmem:[%s1860_s5] sm:$0xff]  }
  0x2c   :  { %1275 = vmatpush3.bf16.msra.mxu0 %v1413_v12  ;;  %v1457_v12 = vld [vmem:[%s1860_s5 + $0x8] sm:$0xff]  }
  0x2d   :  { %1297 = vmatpush3.bf16.msra.mxu1 %v1415_v13  ;;  %1276 = vmatprep.subr.bf16.mxu0 %v1416_v14 }
  0x2e   :  { %1298 = vmatprep.subr.bf16.mxu1 %v1418_v15 }
  0x30   :  { %1277 = vmatpush3.bf16.msra.mxu0 %v1417_v16 }
  0x31   :  { %1299 = vmatpush3.bf16.msra.mxu1 %v1419_v17  ;;  %1278 = vmatprep.subr.bf16.mxu0 %v1420_v18 }
  0x32   :  { %1300 = vmatprep.subr.bf16.mxu1 %v1422_v19 }
  0x34   :  { %1279 = vmatpush3.bf16.msra.mxu0 %v1421_v20 }
  0x35   :  { %1301 = vmatpush3.bf16.msra.mxu1 %v1423_v21  ;;  %1280 = vmatprep.subr.bf16.mxu0 %v1424_v22 }
  0x36   :  { %1302 = vmatprep.subr.bf16.mxu1 %v1426_v23 }
  0x38   :  { %1281 = vmatpush3.bf16.msra.mxu0 %v1425_v24 }
  0x39   :  { %1303 = vmatpush3.bf16.msra.mxu1 %v1427_v25  ;;  %1282 = vmatprep.subr.bf16.mxu0 %v1428_v26 }
  0x3a   :  { %1304 = vmatprep.subr.bf16.mxu1 %v1430_v28 }
  0x3c   :  { %1283 = vmatpush3.bf16.msra.mxu0 %v1429_v27 }
  0x3d   :  { %1305 = vmatpush3.bf16.msra.mxu1 %v1431_v30  ;;  %1284 = vmatprep.subr.bf16.mxu0 %v1432_v31 }
  0x3e   :  { %1306 = vmatprep.subr.bf16.mxu1 %v1434_v32 }
  0x40   :  { %1285 = vmatpush3.bf16.msra.mxu0 %v1433_v33 }
  0x41   :  { %1307 = vmatpush3.bf16.msra.mxu1 %v1443_v40  ;;  %1326 = vmatprep.subr.bf16.mxu0 %v1491_v53  ;;  %v179_v40 = vld [vmem:[#allocation2] sm:$0xff] }
  0x42   :  { %1346 = vmatprep.subr.bf16.mxu1 %v1491_v53 }
  0x43   :  { %864 = vmatmul.mubr.bf16.vlgmr.msra.gmra.mrb[4].mxu0 %v361_v58 }
  0x44   :  { %1327 = vmatpush3.bf16.msra.mxu0 %v1448_v60  ;;  %1342 = vmatprep.mubr.msk.bf16.mxu0 %vm1492_vm0, %v1491_v53 }
  0x45   :  { %1328 = vmatprep.subr.bf16.mxu0 %v1491_v53  ;;  %905 = vmatmul.mubr.bf16.vlgmr.msra.gmra.mrb[4].mxu1 %v363_v1 }
  0x46   :  { %1350 = vmatprep.mubr.msk.bf16.mxu1 %vm1492_vm0, %v1491_v53  ;;  %1347 = vmatpush3.bf16.msra.mxu1 %v1456_v11  ;;  %v1125_v11 = vand.u32 127, %v204_v29 }
  0x47   :  { %1348 = vmatprep.subr.bf16.mxu1 %v1491_v53 }
  0x48   :  { %1329 = vmatpush3.bf16.msra.mxu0 %v1449_v43  ;;  %vm1126_vm2 = vcmp.lt.s32.totalorder %v1125_v11, 2 }
  0x49   :  { %1330 = vmatprep.subr.bf16.mxu0 %v1491_v53 }
  0x4a   :  { %1349 = vmatpush3.bf16.msra.mxu1 %v1457_v12 }
  0x4c   :  { %1331 = vmatpush3.bf16.msra.mxu0 %v1450_v2 }
  0x4d   :  { %1332 = vmatprep.subr.bf16.mxu0 %v1491_v53 }
  0x50   :  { %1333 = vmatpush3.bf16.msra.mxu0 %v1451_v3 }
  0x51   :  { %1334 = vmatprep.subr.bf16.mxu0 %v1491_v53 }
  0x54   :  { %1335 = vmatpush3.bf16.msra.mxu0 %v1452_v4 }
  0x55   :  { %1336 = vmatprep.subr.bf16.mxu0 %v1491_v53 }
  0x58   :  { %1337 = vmatpush3.bf16.msra.mxu0 %v1453_v5 }
  0x59   :  { %1338 = vmatprep.subr.bf16.mxu0 %v1491_v53 }
  0x5c   :  { %1339 = vmatpush3.bf16.msra.mxu0 %v1454_v6 }
  0x5d   :  { %1340 = vmatprep.subr.bf16.mxu0 %v1491_v53 }
  0x60   :  { %1341 = vmatpush3.bf16.msra.mxu0 %v1455_v7 }
  0x63   :  { %1343 = vmatmul.mubr.bf16.vlgmr.msra.gmra.mrb[8].mxu0 %v925_v10 }
  0xf6   :  { %v1242_v13 = vpop.f32.mrb[0].mxu0 }
  0xf7   :  { %v1264_v14 = vpop.f32.mrb[0].mxu1  ;;  %v1243_v15 = vpop.f32.mrb[1].mxu0 }
  0xf8   :  { %v1244_v16 = vadd.f32 %v1243_v15, %v1242_v13  ;;  %v1265_v17 = vpop.f32.mrb[1].mxu1  ;;  %v1245_v18 = vpop.f32.mrb[2].mxu0 }
  0xf9   :  { %v1266_v19 = vadd.f32 %v1265_v17, %v1264_v14  ;;  %v1267_v20 = vpop.f32.mrb[2].mxu1  ;;  %v1246_v21 = vpop.f32.mrb[3].mxu0 }
  0xfa   :  { %v1247_v22 = vadd.f32 %v1246_v21, %v1245_v18  ;;  %v1268_v23 = vpop.f32.mrb[3].mxu1 }
  0xfb   :  { %v825_v24 = vadd.f32 %v1266_v19, %v1244_v16  ;;  %v1269_v25 = vadd.f32 %v1268_v23, %v1267_v20 }
  0xfd   :  { %v828_v26 = vadd.f32 %v1269_v25, %v1247_v22 }
 0x116   :  { %v1286_v27 = vpop.f32.mrb[4].mxu0 }
 0x117   :  { %v1287_v28 = vpop.f32.mrb[5].mxu0 }
 0x118   :  { %v1288_v30 = vadd.f32 %v1287_v28, %v1286_v27  ;;  %v1289_v31 = vpop.f32.mrb[6].mxu0  ;;  %v1308_v32 = vpop.f32.mrb[4].mxu1 }
 0x119   :  { %v1290_v33 = vpop.f32.mrb[7].mxu0  ;;  %v1309_v36 = vpop.f32.mrb[5].mxu1 }
 0x11a   :  { %v866_v34 = vadd.f32 %v1288_v30, %v825_v24  ;;  %v1291_v35 = vadd.f32 %v1290_v33, %v1289_v31  ;;  %v1310_v37 = vadd.f32 %v1309_v36, %v1308_v32  ;;  %v1311_v38 = vpop.f32.mrb[6].mxu1 }
 0x11b   :  { %v1312_v41 = vpop.f32.mrb[7].mxu1 }
 0x11c   :  { %v869_v39 = vadd.f32 %v1291_v35, %v828_v26  ;;  %v907_v42 = vadd.f32 %v1310_v37, %v866_v34  ;;  %v1313_v44 = vadd.f32 %v1312_v41, %v1311_v38 }
 0x11e   :  { %v913_v46 = vadd.f32 %v907_v42, %v179_v40  ;;  %v910_v47 = vadd.f32 %v1313_v44, %v869_v39 }
 0x120   :  { %916 = vst.msk [vmem:[#allocation2] sm:$0xff] %vm32_vm1, %v913_v46  ;;  %v914_v48 = vadd.f32 %v910_v47, %v180_v45 }
 0x122   :  { %917 = vst.msk [vmem:[#allocation2 + $0x8] sm:$0xff] %vm32_vm1, %v914_v48 }
 0x127   :  { %v921_v49 = vld [vmem:[#allocation2] sm:$0xff] }
 0x129   :  { %v922_v54 = vld [vmem:[#allocation2 + $0x8] sm:$0xff] }
 0x136   :  { %v1024_v50 = vpop.f32.mrb[8].mxu0 }
 0x137   :  { %v1031_v52 = vadd.f32 %v1024_v50, %v921_v49  ;;  %v1344_v53 = vpop.f32.mrb[9].mxu0 }
 0x138   :  { %v1027_v55 = vpop.f32.mrb[10].mxu0 }
 0x139   :  { %v1040_v56 = vadd.f32 %v1219_v51, %v1031_v52  ;;  %v1032_v57 = vadd.f32 %v1027_v55, %v922_v54  ;;  %v1345_v58 = vpop.f32.mrb[11].mxu0 }
 0x13b   :  { %v1041_v59 = vadd.f32 %v1219_v51, %v1032_v57  ;;  %v1042_v60 = vmax.f32 %v1040_v56, 0.0 }
 0x13d   :  { %v1043_v61 = vmax.f32 %v1041_v59, 0.0 }
 0x13f   :  { %v1044_v62 = vpack.c.bf16 %v1043_v61, %v1042_v60 }
 0x141   :  { %1351 = vmatmul.mubr.msk.bf16.vlgmr.msra.gmra.mrb[8].mxu1 %vm32_vm1, %v1044_v62 }
 0x214   :  { %v1105_v0 = vpop.f32.mrb[8].mxu1 }
 0x215   :  { %v1106_v1 = vadd.f32 %v1220_v63, %v1105_v0  ;;  %v1352_v43 = vpop.f32.mrb[9].mxu1 }
 0x216   :  { %v1108_v2 = vpop.f32.mrb[10].mxu1 }
 0x217   :  { %v1224_v3 = vmul.f32 -1.442695, %v1106_v1  ;;  %v1109_v4 = vadd.f32 %v1220_v63, %v1108_v2  ;;  %v1353_v5 = vpop.f32.mrb[11].mxu1 }
 0x219   :  { %1458 = vpow2.f32 %v1224_v3  ;;  %v1225_v6 = vmul.f32 -1.442695, %v1109_v4 }
 0x21b   :  { %1460 = vpow2.f32 %v1225_v6 }
 0x223   :  { %v1459_v7 = vpop.eup %1458 }
 0x224   :  { %v1118_v8 = vadd.f32 1.0, %v1459_v7 }
 0x225   :  { %v1461_v9 = vpop.eup %1460 }
 0x226   :  { %1462 = vrcp.f32 %v1118_v8  ;;  %v1119_v10 = vadd.f32 1.0, %v1461_v9 }
 0x228   :  { %1464 = vrcp.f32 %v1119_v10 }
 0x230   :  { %v1463_v12 = vpop.eup %1462 }
 0x231   :  { %v1127_v13 = vsel %vm1126_vm2, %v1463_v12, %v1106_v1 }
 0x232   :  { %v1465_v14 = vpop.eup %1464  ;;  %1129 = vst [vmem:[#allocation3] sm:$0xff] %v1127_v13 }
 0x233   :  { %v1128_v15 = vsel %vm1126_vm2, %v1465_v14, %v1109_v4 }
 0x234   :  { %1130 = vst [vmem:[#allocation3 + $0x8] sm:$0xff] %v1128_v15 }
 0x235   :  { %1135 = vsyncadd [#allocation4], 224  ;;  %s1493_s4 = smov [#allocation3]  }
 0x236   :  { %s1136_s6 = sshll.u32 %s1493_s4, 4  ;;  %s1137_s6 = int_to_ptr.vmem [resolvable:$true] %s1136_s6 }
 0x237   :  { %s1466_s0 = scalar_lea.vmem %s1137_s6, 32  ;;  %s1470_s2 = scalar_lea.vmem %s1137_s6, 256 }
 0x238   :  { %p1467_p0 = scmp.ne.s32.totalorder %s1137_s6, %s1466_s0  ;;  %p1471_p1 = scmp.lt.s32.totalorder %s1137_s6, %s1137_s6 }
 0x239   :  { %p1472_p2 = scmp.lt.s32.totalorder %s1470_s2, %s1466_s0 }
 0x23b   :  { %p1473_p3 = por %p1472_p2, %p1471_p1 }
 0x23d   :  { %p1474_p4 = pnand %p1473_p3, %p1467_p0 }
 0x23f   :  { %1477 = shalt.err (!%p1474_p4)
}
 0x240   :  { %s1478_s25 = scalar_lea.hbm %s1862_s7, 32 }
 0x241   :  { %p1479_p5 = scmp.ne.s32.totalorder %s1862_s7, %s1478_s25  ;;  %p1482_p6 = scmp.lt.u32.totalorder %s1478_s25, %s1862_s7 }
 0x243   :  { %p1484_p7 = pnand %p1482_p6, %p1479_p5 }
 0x245   :  { %1487 = shalt.err (!%p1484_p7)
}
 0x246   :  { %s1494_s30 = smov 32   ;;  %s1495_s8 = smov 2  }
 0x247   :  { %1142 = dma.vmem_to_hbm [thread:$0]  %s1137_s6, 32, %s1862_s7, [#allocation4], %s1494_s30, %s1494_s30, %s1495_s8  }
 0x248   :  { %1488 = dma.done.wait [#allocation4], 256  }
 0x249   :  { %1489 = vsyncadd [#allocation4], 4294967040 }
 0x24a   :  { %1146 = vsyncpa [#allocation4], 1 }

</bundles_post_ra>
